<compile_context>
chip_gen: v7x
topology: tpu7x:2x2x1
jax: 0.10.0
libtpu: 0.0.40
codegen_flags: <defaults>
</compile_context>

<pallas_src>
import functools

import numpy as np
import jax
import jax.numpy as jnp
from jax import lax
from jax.experimental import pallas as pl
from jax.experimental.pallas import tpu as pltpu


def _round_up(x, m):
    return (x + m - 1) // m * m


def _geometry(maze_size, c_in):
    """Shared shape arithmetic (wrapper + packer must agree)."""
    s0 = maze_size
    s1 = s0 // 2 + 1                 # conv1: k=3, s=2, p=1
    s2 = (s1 - 3) // 2 + 1           # conv2: k=3, s=2, p=0
    hp = 2 * (s1 + 1)                # padded H (1 before, rest after), even
    wp = hp                          # padded W
    wc = wp * c_in                   # per-parity lane group width
    kcol = _round_up(2 * wc, 128)    # lane width of one packed input row
    # Guard the asymmetric padding: the receptive field must never reach the
    # trailing pad rows/cols that only exist for even-size alignment.
    assert 2 * (s1 - 1) + 2 < hp and 2 * (s1 - 1) + 2 < wp
    assert 2 * (s2 - 1) + 2 <= s1 - 1
    assert hp >= s0 + 1 and wp >= s0 + 1
    return s0, s1, s2, hp, wp, wc, kcol


# ---------------------------------------------------------------------------
# Fused Pallas kernel: conv1 + conv2 + fc + (policy|value) head
# ---------------------------------------------------------------------------

def _fused_forward_kernel(x_ref, g1_ref, b1_ref, g2_ref, b2_ref,
                          wfc_ref, bfc_ref, wh_ref, bh_ref, out_ref,
                          *, pb, s1, s2):
    f32 = jnp.float32
    wdt = g1_ref.dtype               # MXU compute dtype (bf16 or f32)

    # x rows = (h//2, b) with b innermost; lanes = (h parity, w, ci).
    x = x_ref[...]                                        # [(s1+1)*pb, kcol]

    # ---- conv1 (k=3, s=2, p=1) + ReLU: ONE K=2*kcol MXU pass ---------------
    # Row slab A (rows 0..s1*pb) carries input rows 2*oh1 / 2*oh1+1 on its
    # lanes (taps kh=0,1); slab B (shifted by pb rows) carries 2*oh1+2 (kh=2).
    # Tap selection is therefore two contiguous, aligned row slices.
    m1 = s1 * pb
    lhs1 = jnp.concatenate([x[0:m1], x[pb:pb + m1]], axis=1).astype(wdt)
    a1 = jnp.dot(lhs1, g1_ref[...], preferred_element_type=f32)
    h1 = jnp.maximum(a1 + b1_ref[...], 0.0)               # [s1*pb, n1], rows (oh1, b)

    # ---- conv2 (k=3, s=2, p=0) + ReLU: 3 taps concatenated along K ---------
    taps = []
    for kh in range(3):
        rows = [h1[(2 * o + kh) * pb:(2 * o + kh + 1) * pb] for o in range(s2)]
        taps.append(jnp.concatenate(rows, axis=0))        # [s2*pb, n1], rows (oh2, b)
    lhs2 = jnp.concatenate(taps, axis=1).astype(wdt)       # [s2*pb, 3*n1]
    a2 = jnp.dot(lhs2, g2_ref[...], preferred_element_type=f32)
    h2 = jnp.maximum(a2 + b2_ref[...], 0.0)                # [s2*pb, n2], rows (oh2, b)

    # ---- fc (Flatten + Linear + ReLU): oh2 row-groups moved onto the lanes -
    lhs3 = jnp.concatenate([h2[r * pb:(r + 1) * pb] for r in range(s2)],
                           axis=1).astype(wdt)             # [pb, s2*n2]
    a3 = jnp.dot(lhs3, wfc_ref[...], preferred_element_type=f32)
    h3 = jnp.maximum(a3 + bfc_ref[...], 0.0)               # [pb, lin_p]

    # ---- fused policy|value head (lane-dense [pb, 128] output) -------------
    out = jnp.dot(h3.astype(wdt), wh_ref[...], preferred_element_type=f32) + bh_ref[...]
    out_ref[...] = out.astype(out_ref.dtype)


# ---------------------------------------------------------------------------
# Parameter init (torch layout) and one-time packing into kernel layout
# ---------------------------------------------------------------------------

def init_params(key, *, c_in, hidden_size, maze_size, num_outputs):
    lin_hidden = hidden_size * 8
    conv_out = (maze_size // 2 + 1) // 2
    flat_dim = conv_out ** 2 * hidden_size * 2

    ks = jax.random.split(key, 10)
    scale = 0.05
    # Linear weights stored as [in, out]; to load real torch weights, transpose.
    return {
        "conv1_w": scale * jax.random.normal(ks[0], (hidden_size, c_in, 3, 3), jnp.float32),
        "conv1_b": scale * jax.random.normal(ks[1], (hidden_size,), jnp.float32),
        "conv2_w": scale * jax.random.normal(ks[2], (2 * hidden_size, hidden_size, 3, 3), jnp.float32),
        "conv2_b": scale * jax.random.normal(ks[3], (2 * hidden_size,), jnp.float32),
        "fc_w": scale * jax.random.normal(ks[4], (flat_dim, lin_hidden), jnp.float32),
        "fc_b": scale * jax.random.normal(ks[5], (lin_hidden,), jnp.float32),
        "policy_w": scale * jax.random.normal(ks[6], (lin_hidden, num_outputs), jnp.float32),
        "policy_b": scale * jax.random.normal(ks[7], (num_outputs,), jnp.float32),
        "value_w": scale * jax.random.normal(ks[8], (lin_hidden, 1), jnp.float32),
        "value_b": scale * jax.random.normal(ks[9], (1,), jnp.float32),
    }


def pack_params(params, *, maze_size, num_outputs, compute_dtype=jnp.bfloat16):
    """One-time re-layout of torch-style weights into the fused-kernel operands."""
    w1 = params["conv1_w"]                     # [Hd, Cin, 3, 3] (OIHW)
    w2 = params["conv2_w"]                     # [2Hd, Hd, 3, 3]
    hd, cin = int(w1.shape[0]), int(w1.shape[1])
    hd2 = int(w2.shape[0])
    fc_w, fc_b = params["fc_w"], params["fc_b"]
    lin = int(fc_w.shape[1])
    a = num_outputs

    s0, s1, s2, hp, wp, wc, kcol = _geometry(maze_size, cin)
    n1 = _round_up(s1 * hd, 128)               # 112 -> 128
    n2 = _round_up(s2 * hd2, 128)              # 96  -> 128
    lp = _round_up(lin, 128)
    nout = _round_up(a + 1, 128)

    def tap_matrices(w, w_in, s_out, ci, co):
        # Stride-2 column selection fused with the conv tap weights:
        # g[kh, w*ci + i, ow*co + o] = w[o, i, kh, kw] where w == 2*ow + kw.
        sel = np.zeros((3, w_in, s_out), np.float32)
        for kw in range(3):
            for o in range(s_out):
                sel[kw, 2 * o + kw, o] = 1.0
        g = jnp.einsum("KWO,CIHK->HWIOC", jnp.asarray(sel), w)
        return g.reshape(3, w_in * ci, s_out * co)

    # conv1: K layout = [slab A even | slab A odd | slab B even | slab B odd(=0)].
    g1t = tap_matrices(w1, wp, s1, cin, hd)                  # [3, wc, s1*hd]
    g1 = jnp.zeros((2 * kcol, n1), jnp.float32)
    g1 = g1.at[0:wc, :s1 * hd].set(g1t[0])
    g1 = g1.at[wc:2 * wc, :s1 * hd].set(g1t[1])
    g1 = g1.at[kcol:kcol + wc, :s1 * hd].set(g1t[2])
    b1 = jnp.zeros((1, n1), jnp.float32).at[0, :s1 * hd].set(jnp.tile(params["conv1_b"], s1))

    # conv2: three kh taps stacked along K (each n1 rows; pad rows/cols zero).
    g2t = tap_matrices(w2, s1, s2, hd, hd2)                  # [3, s1*hd, s2*hd2]
    g2 = jnp.zeros((3 * n1, n2), jnp.float32)
    for kh in range(3):
        g2 = g2.at[kh * n1:kh * n1 + s1 * hd, :s2 * hd2].set(g2t[kh])
    b2 = jnp.zeros((1, n2), jnp.float32).at[0, :s2 * hd2].set(jnp.tile(params["conv2_b"], s2))

    # fc: torch flatten order (c2, oh2, ow2) -> kernel column order
    # (oh2-group | ow2*hd2 + c2), each oh2 group padded to n2 lanes.
    wfc_r = fc_w.reshape(hd2, s2, s2, lin).transpose(1, 2, 0, 3).reshape(s2, s2 * hd2, lin)
    wfc = jnp.zeros((s2 * n2, lp), jnp.float32)
    for r in range(s2):
        wfc = wfc.at[r * n2:r * n2 + s2 * hd2, :lin].set(wfc_r[r])
    bfc = jnp.zeros((1, lp), jnp.float32).at[0, :lin].set(fc_b)

    # policy + value fused into one lane-dense head: cols [0, A) policy, col A value.
    wh = jnp.zeros((lp, nout), jnp.float32)
    wh = wh.at[:lin, :a].set(params["policy_w"]).at[:lin, a].set(params["value_w"][:, 0])
    bh = jnp.zeros((1, nout), jnp.float32)
    bh = bh.at[0, :a].set(params["policy_b"]).at[0, a].set(params["value_b"][0])

    cd = compute_dtype
    return {"g1": g1.astype(cd), "b1": b1, "g2": g2.astype(cd), "b2": b2,
            "wfc": wfc.astype(cd), "bfc": bfc, "whead": wh.astype(cd), "bhead": bh}


# ---------------------------------------------------------------------------
# Forward wrapper (mirrors SimpleMazeNet.forward + value_function)
# ---------------------------------------------------------------------------

def simple_maze_net_forward(packed, obs_map_nhwc, *, num_outputs, block_batch=None):
    """Returns (policy [B, num_outputs], value [B])."""
    b, s0, s0w, c = obs_map_nhwc.shape
    assert s0 == s0w, "square maze expected"
    _, s1, s2, hp, wp, wc, kcol = _geometry(s0, c)

    wdt = packed["g1"].dtype
    n1 = packed["g1"].shape[1]
    n2 = packed["g2"].shape[1]
    lp = packed["whead"].shape[0]
    nout = packed["whead"].shape[1]
    assert packed["g1"].shape[0] == 2 * kcol, "packed params inconsistent with observation shape"

    # Per-block batch: small batches run in one grid step; large batches tile
    # at 128 rows/step so weights (constant index_map) stay VMEM-resident and
    # only the x / out blocks move per step.
    pb = block_batch if block_batch is not None else min(128, _round_up(b, 8))
    pb = _round_up(pb, 8)
    n_blocks = pl.cdiv(b, pb)
    bp = n_blocks * pb

    # NHWC stays NHWC end-to-end (channels on the lane axis); torch's
    # permute(0,3,1,2) is absorbed into the packed weight layout.
    # Row layout: (block, h//2, b_in_block); lane layout: (h parity, w, ci).
    x = obs_map_nhwc.astype(jnp.float32)
    xp = jnp.pad(x, ((0, bp - b), (1, hp - 1 - s0), (1, wp - 1 - s0), (0, 0)))
    xp = xp.reshape(bp, hp // 2, 2 * wc)
    xp = jnp.pad(xp, ((0, 0), (0, 0), (0, kcol - 2 * wc)))
    x2d = (xp.reshape(n_blocks, pb, hp // 2, kcol)
             .transpose(0, 2, 1, 3)
             .reshape(n_blocks * (hp // 2) * pb, kcol)
             .astype(wdt))
    rows_per_block = (hp // 2) * pb

    kernel = functools.partial(_fused_forward_kernel, pb=pb, s1=s1, s2=s2)
    weights = (packed["g1"], packed["b1"], packed["g2"], packed["b2"],
               packed["wfc"], packed["bfc"], packed["whead"], packed["bhead"])

    def const_spec(arr):
        nd = arr.ndim
        return pl.BlockSpec(arr.shape, lambda i, _n=nd: (0,) * _n)

    in_specs = ([pl.BlockSpec((rows_per_block, kcol), lambda i: (i, 0))]
                + [const_spec(w) for w in weights])
    out_specs = pl.BlockSpec((pb, nout), lambda i: (i, 0))

    flops = 2 * n_blocks * (s1 * pb * (2 * kcol) * n1
                            + s2 * pb * (3 * n1) * n2
                            + pb * (s2 * n2) * lp
                            + pb * lp * nout)
    bytes_accessed = int(x2d.size) * x2d.dtype.itemsize
    bytes_accessed += sum(int(w.size) * w.dtype.itemsize for w in weights)
    bytes_accessed += bp * nout * 4

    # TODO(synk): if the resident weight set ever grows, consider
    # pipeline_mode=pl.Buffered(1) on the constant-index weight specs and an
    # explicit vmem_limit_bytes for v7x's 64 MiB VMEM; at <0.5 MiB it is moot.
    out = pl.pallas_call(
        kernel,
        grid=(n_blocks,),
        out_shape=jax.ShapeDtypeStruct((bp, nout), jnp.float32),
        in_specs=in_specs,
        out_specs=out_specs,
        compiler_params=pltpu.CompilerParams(dimension_semantics=("parallel",)),
        cost_estimate=pl.CostEstimate(flops=int(flops), transcendentals=0,
                                      bytes_accessed=int(bytes_accessed)),
    )(x2d, *weights)

    policy = out[:b, :num_outputs]
    value = out[:b, num_outputs]                 # value_branch(...).squeeze(1)
    return policy, value


# ---------------------------------------------------------------------------
# Plain-JAX reference (for correctness verification only)
# ---------------------------------------------------------------------------

def _reference_forward(params, obs):
    x = jnp.transpose(obs, (0, 3, 1, 2)).astype(jnp.float32)
    dn = ("NCHW", "OIHW", "NCHW")
    y = lax.conv_general_dilated(x, params["conv1_w"], (2, 2), ((1, 1), (1, 1)),
                                 dimension_numbers=dn)
    y = jax.nn.relu(y + params["conv1_b"][None, :, None, None])
    y = lax.conv_general_dilated(y, params["conv2_w"], (2, 2), "VALID",
                                 dimension_numbers=dn)
    y = jax.nn.relu(y + params["conv2_b"][None, :, None, None])
    feat = y.reshape(y.shape[0], -1)
    h = jax.nn.relu(feat @ params["fc_w"] + params["fc_b"])
    pol = h @ params["policy_w"] + params["policy_b"]
    val = (h @ params["value_w"] + params["value_b"])[:, 0]
    return pol, val


# ---------------------------------------------------------------------------
# Main
# ---------------------------------------------------------------------------

if __name__ == "__main__":
    BATCH = 2
    C_IN = 4           # channels of obs['map']
    MAZE_SIZE = 13     # module default
    HIDDEN_SIZE = 16   # module default
    NUM_OUTPUTS = 4    # e.g. 4 maze actions

    root = jax.random.PRNGKey(0)
    k_inp, k_par = jax.random.split(root)

    obs_map = jax.random.normal(k_inp, (BATCH, MAZE_SIZE, MAZE_SIZE, C_IN), jnp.float32)
    params = init_params(k_par, c_in=C_IN, hidden_size=HIDDEN_SIZE,
                         maze_size=MAZE_SIZE, num_outputs=NUM_OUTPUTS)
    ref_policy, ref_value = _reference_forward(params, obs_map)

    # f32 packing: tight check of the layout/indexing.  bf16 packing: the
    # performance configuration, checked at bf16-appropriate tolerance.
    for cdt, atol, rtol in ((jnp.float32, 1e-3, 1e-3), (jnp.bfloat16, 5e-3, 5e-2)):
        packed = pack_params(params, maze_size=MAZE_SIZE, num_outputs=NUM_OUTPUTS,
                             compute_dtype=cdt)
        fwd = jax.jit(functools.partial(simple_maze_net_forward, num_outputs=NUM_OUTPUTS))
        policy, value = fwd(packed, obs_map)
        policy = jax.block_until_ready(policy)
        value = jax.block_until_ready(value)

        assert policy.shape == (BATCH, NUM_OUTPUTS), policy.shape
        assert value.shape == (BATCH,), value.shape
        assert policy.dtype == jnp.float32 and value.dtype == jnp.float32

        assert jnp.allclose(policy, ref_policy, atol=atol, rtol=rtol), (
            f"policy mismatch at compute_dtype={cdt}")
        assert jnp.allclose(value, ref_value, atol=atol, rtol=rtol), (
            f"value mismatch at compute_dtype={cdt}")

    print("KERNEL_OK")
</pallas_src>

<mosaic_0001>
module attributes {stable_mosaic.version = 11 : i64} {
  func.func @_fused_forward_kernel(%arg0: i32, %arg1: memref<64x128xf32, #tpu.memory_space<vmem>>, %arg2: memref<256x128xf32, #tpu.memory_space<vmem>>, %arg3: memref<1x128xf32, #tpu.memory_space<vmem>>, %arg4: memref<384x128xf32, #tpu.memory_space<vmem>>, %arg5: memref<1x128xf32, #tpu.memory_space<vmem>>, %arg6: memref<384x128xf32, #tpu.memory_space<vmem>>, %arg7: memref<1x128xf32, #tpu.memory_space<vmem>>, %arg8: memref<128x128xf32, #tpu.memory_space<vmem>>, %arg9: memref<1x128xf32, #tpu.memory_space<vmem>>, %arg10: memref<8x128xf32, #tpu.memory_space<vmem>>) attributes {dimension_semantics = [#tpu.dimension_semantics<parallel>], iteration_bounds = array<i64: 1>, scalar_prefetch = 0 : i64, scratch_operands = 0 : i64, tpu.core_type = #tpu.core_type<tc>, window_params = [{transform_indices = @transform_0, window_bounds = array<i64: 64, 128>}, {pipeline_mode = #tpu.pipeline_mode<synchronous>, transform_indices = @transform_1, window_bounds = array<i64: 256, 128>}, {pipeline_mode = #tpu.pipeline_mode<synchronous>, transform_indices = @transform_2, window_bounds = array<i64: 1, 128>}, {pipeline_mode = #tpu.pipeline_mode<synchronous>, transform_indices = @transform_3, window_bounds = array<i64: 384, 128>}, {pipeline_mode = #tpu.pipeline_mode<synchronous>, transform_indices = @transform_4, window_bounds = array<i64: 1, 128>}, {pipeline_mode = #tpu.pipeline_mode<synchronous>, transform_indices = @transform_5, window_bounds = array<i64: 384, 128>}, {pipeline_mode = #tpu.pipeline_mode<synchronous>, transform_indices = @transform_6, window_bounds = array<i64: 1, 128>}, {pipeline_mode = #tpu.pipeline_mode<synchronous>, transform_indices = @transform_7, window_bounds = array<i64: 128, 128>}, {pipeline_mode = #tpu.pipeline_mode<synchronous>, transform_indices = @transform_8, window_bounds = array<i64: 1, 128>}, {transform_indices = @transform_9, window_bounds = array<i64: 8, 128>}]} {
    %c0 = arith.constant 0 : index
    %c0_0 = arith.constant 0 : index
    %0 = vector.load %arg1[%c0, %c0_0] : memref<64x128xf32, #tpu.memory_space<vmem>>, vector<64x128xf32>
    %1 = vector.extract_strided_slice %0 {offsets = [0, 0], sizes = [56, 128], strides = [1, 1]} : vector<64x128xf32> to vector<56x128xf32>
    %2 = vector.extract_strided_slice %0 {offsets = [8, 0], sizes = [56, 128], strides = [1, 1]} : vector<64x128xf32> to vector<56x128xf32>
    %3 = tpu.concatenate %1, %2 in 1 : vector<56x128xf32>, vector<56x128xf32> -> vector<56x256xf32>
    %c0_1 = arith.constant 0 : index
    %c0_2 = arith.constant 0 : index
    %4 = vector.load %arg2[%c0_1, %c0_2] : memref<256x128xf32, #tpu.memory_space<vmem>>, vector<256x128xf32>
    %cst = arith.constant dense<0.000000e+00> : vector<56x128xf32>
    %5 = tpu.matmul %3, %4, %cst {dimension_numbers = #tpu.dot_dimension_numbers<[1], [0], [0], [1], [0, 0, 1, 1], [], []>} : vector<56x256xf32>, vector<256x128xf32>, vector<56x128xf32> -> vector<56x128xf32>
    %c0_3 = arith.constant 0 : index
    %c0_4 = arith.constant 0 : index
    %6 = vector.load %arg3[%c0_3, %c0_4] : memref<1x128xf32, #tpu.memory_space<vmem>>, vector<1x128xf32>
    %7 = vector.broadcast %6 : vector<1x128xf32> to vector<56x128xf32>
    %8 = arith.addf %5, %7 : vector<56x128xf32>
    %cst_5 = arith.constant 0.000000e+00 : f32
    %9 = vector.broadcast %cst_5 : f32 to vector<56x128xf32>
    %10 = arith.maximumf %8, %9 : vector<56x128xf32>
    %11 = vector.extract_strided_slice %10 {offsets = [0, 0], sizes = [8, 128], strides = [1, 1]} : vector<56x128xf32> to vector<8x128xf32>
    %12 = vector.extract_strided_slice %10 {offsets = [16, 0], sizes = [8, 128], strides = [1, 1]} : vector<56x128xf32> to vector<8x128xf32>
    %13 = vector.extract_strided_slice %10 {offsets = [32, 0], sizes = [8, 128], strides = [1, 1]} : vector<56x128xf32> to vector<8x128xf32>
    %14 = tpu.concatenate %11, %12, %13 in 0 : vector<8x128xf32>, vector<8x128xf32>, vector<8x128xf32> -> vector<24x128xf32>
    %15 = vector.extract_strided_slice %10 {offsets = [8, 0], sizes = [8, 128], strides = [1, 1]} : vector<56x128xf32> to vector<8x128xf32>
    %16 = vector.extract_strided_slice %10 {offsets = [24, 0], sizes = [8, 128], strides = [1, 1]} : vector<56x128xf32> to vector<8x128xf32>
    %17 = vector.extract_strided_slice %10 {offsets = [40, 0], sizes = [8, 128], strides = [1, 1]} : vector<56x128xf32> to vector<8x128xf32>
    %18 = tpu.concatenate %15, %16, %17 in 0 : vector<8x128xf32>, vector<8x128xf32>, vector<8x128xf32> -> vector<24x128xf32>
    %19 = vector.extract_strided_slice %10 {offsets = [16, 0], sizes = [8, 128], strides = [1, 1]} : vector<56x128xf32> to vector<8x128xf32>
    %20 = vector.extract_strided_slice %10 {offsets = [32, 0], sizes = [8, 128], strides = [1, 1]} : vector<56x128xf32> to vector<8x128xf32>
    %21 = vector.extract_strided_slice %10 {offsets = [48, 0], sizes = [8, 128], strides = [1, 1]} : vector<56x128xf32> to vector<8x128xf32>
    %22 = tpu.concatenate %19, %20, %21 in 0 : vector<8x128xf32>, vector<8x128xf32>, vector<8x128xf32> -> vector<24x128xf32>
    %23 = tpu.concatenate %14, %18, %22 in 1 : vector<24x128xf32>, vector<24x128xf32>, vector<24x128xf32> -> vector<24x384xf32>
    %c0_6 = arith.constant 0 : index
    %c0_7 = arith.constant 0 : index
    %24 = vector.load %arg4[%c0_6, %c0_7] : memref<384x128xf32, #tpu.memory_space<vmem>>, vector<384x128xf32>
    %cst_8 = arith.constant dense<0.000000e+00> : vector<24x128xf32>
    %25 = tpu.matmul %23, %24, %cst_8 {dimension_numbers = #tpu.dot_dimension_numbers<[1], [0], [0], [1], [0, 0, 1, 1], [], []>} : vector<24x384xf32>, vector<384x128xf32>, vector<24x128xf32> -> vector<24x128xf32>
    %c0_9 = arith.constant 0 : index
    %c0_10 = arith.constant 0 : index
    %26 = vector.load %arg5[%c0_9, %c0_10] : memref<1x128xf32, #tpu.memory_space<vmem>>, vector<1x128xf32>
    %27 = vector.broadcast %26 : vector<1x128xf32> to vector<24x128xf32>
    %28 = arith.addf %25, %27 : vector<24x128xf32>
    %cst_11 = arith.constant 0.000000e+00 : f32
    %29 = vector.broadcast %cst_11 : f32 to vector<24x128xf32>
    %30 = arith.maximumf %28, %29 : vector<24x128xf32>
    %31 = vector.extract_strided_slice %30 {offsets = [0, 0], sizes = [8, 128], strides = [1, 1]} : vector<24x128xf32> to vector<8x128xf32>
    %32 = vector.extract_strided_slice %30 {offsets = [8, 0], sizes = [8, 128], strides = [1, 1]} : vector<24x128xf32> to vector<8x128xf32>
    %33 = vector.extract_strided_slice %30 {offsets = [16, 0], sizes = [8, 128], strides = [1, 1]} : vector<24x128xf32> to vector<8x128xf32>
    %34 = tpu.concatenate %31, %32, %33 in 1 : vector<8x128xf32>, vector<8x128xf32>, vector<8x128xf32> -> vector<8x384xf32>
    %c0_12 = arith.constant 0 : index
    %c0_13 = arith.constant 0 : index
    %35 = vector.load %arg6[%c0_12, %c0_13] : memref<384x128xf32, #tpu.memory_space<vmem>>, vector<384x128xf32>
    %cst_14 = arith.constant dense<0.000000e+00> : vector<8x128xf32>
    %36 = tpu.matmul %34, %35, %cst_14 {dimension_numbers = #tpu.dot_dimension_numbers<[1], [0], [0], [1], [0, 0, 1, 1], [], []>} : vector<8x384xf32>, vector<384x128xf32>, vector<8x128xf32> -> vector<8x128xf32>
    %c0_15 = arith.constant 0 : index
    %c0_16 = arith.constant 0 : index
    %37 = vector.load %arg7[%c0_15, %c0_16] : memref<1x128xf32, #tpu.memory_space<vmem>>, vector<1x128xf32>
    %38 = vector.broadcast %37 : vector<1x128xf32> to vector<8x128xf32>
    %39 = arith.addf %36, %38 : vector<8x128xf32>
    %cst_17 = arith.constant 0.000000e+00 : f32
    %40 = vector.broadcast %cst_17 : f32 to vector<8x128xf32>
    %41 = arith.maximumf %39, %40 : vector<8x128xf32>
    %c0_18 = arith.constant 0 : index
    %c0_19 = arith.constant 0 : index
    %42 = vector.load %arg8[%c0_18, %c0_19] : memref<128x128xf32, #tpu.memory_space<vmem>>, vector<128x128xf32>
    %cst_20 = arith.constant dense<0.000000e+00> : vector<8x128xf32>
    %43 = tpu.matmul %41, %42, %cst_20 {dimension_numbers = #tpu.dot_dimension_numbers<[1], [0], [0], [1], [0, 0, 1, 1], [], []>} : vector<8x128xf32>, vector<128x128xf32>, vector<8x128xf32> -> vector<8x128xf32>
    %c0_21 = arith.constant 0 : index
    %c0_22 = arith.constant 0 : index
    %44 = vector.load %arg9[%c0_21, %c0_22] : memref<1x128xf32, #tpu.memory_space<vmem>>, vector<1x128xf32>
    %45 = vector.broadcast %44 : vector<1x128xf32> to vector<8x128xf32>
    %46 = arith.addf %43, %45 : vector<8x128xf32>
    %c0_23 = arith.constant 0 : index
    %c0_24 = arith.constant 0 : index
    %47 = vector.load %arg10[%c0_23, %c0_24] : memref<8x128xf32, #tpu.memory_space<vmem>>, vector<8x128xf32>
    tpu.vector_store %arg10[%c0_23, %c0_24], %46 {strides = array<i32>} : memref<8x128xf32, #tpu.memory_space<vmem>>, vector<8x128xf32>,
    return
  }
  func.func @transform_0(%arg0: i32) -> (i32, i32) {
    %c0_i32 = arith.constant 0 : i32
    %c0_i32_0 = arith.constant 0 : i32
    return %arg0, %c0_i32 : i32, i32
  }
  func.func @transform_1(%arg0: i32) -> (i32, i32) {
    %c0_i32 = arith.constant 0 : i32
    %c0_i32_0 = arith.constant 0 : i32
    %c0_i32_1 = arith.constant 0 : i32
    return %c0_i32, %c0_i32_0 : i32, i32
  }
  func.func @transform_2(%arg0: i32) -> (i32, i32) {
    %c0_i32 = arith.constant 0 : i32
    %c0_i32_0 = arith.constant 0 : i32
    %c0_i32_1 = arith.constant 0 : i32
    return %c0_i32, %c0_i32_0 : i32, i32
  }
  func.func @transform_3(%arg0: i32) -> (i32, i32) {
    %c0_i32 = arith.constant 0 : i32
    %c0_i32_0 = arith.constant 0 : i32
    %c0_i32_1 = arith.constant 0 : i32
    return %c0_i32, %c0_i32_0 : i32, i32
  }
  func.func @transform_4(%arg0: i32) -> (i32, i32) {
    %c0_i32 = arith.constant 0 : i32
    %c0_i32_0 = arith.constant 0 : i32
    %c0_i32_1 = arith.constant 0 : i32
    return %c0_i32, %c0_i32_0 : i32, i32
  }
  func.func @transform_5(%arg0: i32) -> (i32, i32) {
    %c0_i32 = arith.constant 0 : i32
    %c0_i32_0 = arith.constant 0 : i32
    %c0_i32_1 = arith.constant 0 : i32
    return %c0_i32, %c0_i32_0 : i32, i32
  }
  func.func @transform_6(%arg0: i32) -> (i32, i32) {
    %c0_i32 = arith.constant 0 : i32
    %c0_i32_0 = arith.constant 0 : i32
    %c0_i32_1 = arith.constant 0 : i32
    return %c0_i32, %c0_i32_0 : i32, i32
  }
  func.func @transform_7(%arg0: i32) -> (i32, i32) {
    %c0_i32 = arith.constant 0 : i32
    %c0_i32_0 = arith.constant 0 : i32
    %c0_i32_1 = arith.constant 0 : i32
    return %c0_i32, %c0_i32_0 : i32, i32
  }
  func.func @transform_8(%arg0: i32) -> (i32, i32) {
    %c0_i32 = arith.constant 0 : i32
    %c0_i32_0 = arith.constant 0 : i32
    %c0_i32_1 = arith.constant 0 : i32
    return %c0_i32, %c0_i32_0 : i32, i32
  }
  func.func @transform_9(%arg0: i32) -> (i32, i32) {
    %c0_i32 = arith.constant 0 : i32
    %c0_i32_0 = arith.constant 0 : i32
    return %arg0, %c0_i32 : i32, i32
  }
}

</mosaic_0001>

<bundles_post_ra>
// kernel: simple_maze_net_forward.1
= control target key start
LH: loop header
LB: loop body
LE: loop exit
PB: predicated region body
PF: predicated region fallthrough
CT: control target
= control target key end

     0   :  { %vm1167_vm0 = vmmov 0   ;;  %s1737_s1 = inlined_call_operand.vmem [shape: f32[256,128], index: 1, kind: input, shape index: {}]   ;;  %s1738_s0 = inlined_call_operand.vmem [shape: f32[64,128], index: 0, kind: input, shape index: {}]   ;;  %s1739_s3 = inlined_call_operand.vmem [shape: f32[384,128], index: 3, kind: input, shape index: {}]   ;;  %s1740_s5 = inlined_call_operand.vmem [shape: f32[384,128], index: 5, kind: input, shape index: {}]   ;;  %s1741_s2 = inlined_call_operand.vmem [shape: f32[1,128], index: 2, kind: input, shape index: {}]   ;;  %s1742_s4 = inlined_call_operand.vmem [shape: f32[1,128], index: 4, kind: input, shape index: {}]   ;;  %s1743_s7 = inlined_call_operand.vmem [shape: f32[128,128], index: 7, kind: input, shape index: {}]   ;;  %s1744_s6 = inlined_call_operand.vmem [shape: f32[1,128], index: 6, kind: input, shape index: {}]   ;;  %s1745_s8 = inlined_call_operand.vmem [shape: f32[1,128], index: 8, kind: input, shape index: {}]   ;;  %s1746_s9 = inlined_call_operand.vmem [shape: f32[8,128], index: 9, kind: output, shape index: {}]  }
   0x1   :  { %v56_v0 = vld [vmem:[%s1737_s1 + $0x80] sm:$0xff]  ;;  %v57_v1 = vld [vmem:[%s1737_s1 + $0x88] sm:$0xff]  ;;  %v58_v5 = vld [vmem:[%s1737_s1 + $0x90] sm:$0xff] }
   0x2   :  { %v40_v2 = vld [vmem:[%s1737_s1] sm:$0xff]  ;;  %v995_v3 = vpack.c.bf16 %v57_v1, %v56_v0  ;;  %v41_v4 = vld [vmem:[%s1737_s1 + $0x8] sm:$0xff]  ;;  %v59_v6 = vld [vmem:[%s1737_s1 + $0x98] sm:$0xff] }
   0x3   :  { %v997_v7 = vpack.c.bf16 %v41_v4, %v40_v2  ;;  %v999_v8 = vpack.c.bf16 %v59_v6, %v58_v5  ;;  %v42_v9 = vld [vmem:[%s1737_s1 + $0x10] sm:$0xff]  ;;  %v43_v10 = vld [vmem:[%s1737_s1 + $0x18] sm:$0xff]  ;;  %v60_v11 = vld [vmem:[%s1737_s1 + $0xa0] sm:$0xff] }
   0x4   :  { %996 = vmatprep.subr.bf16.mxu0 %v995_v3  ;;  %v61_v12 = vld [vmem:[%s1737_s1 + $0xa8] sm:$0xff]  ;;  %v1001_v13 = vpack.c.bf16 %v43_v10, %v42_v9  ;;  %v44_v15 = vld [vmem:[%s1737_s1 + $0x20] sm:$0xff]  ;;  %v62_v17 = vld [vmem:[%s1737_s1 + $0xb0] sm:$0xff] }
   0x5   :  { %998 = vmatpush3.bf16.msra.mxu0 %v997_v7  ;;  %v1003_v14 = vpack.c.bf16 %v61_v12, %v60_v11  ;;  %v45_v16 = vld [vmem:[%s1737_s1 + $0x28] sm:$0xff]  ;;  %v63_v18 = vld [vmem:[%s1737_s1 + $0xb8] sm:$0xff]  ;;  %v46_v21 = vld [vmem:[%s1737_s1 + $0x30] sm:$0xff] }
   0x6   :  { %1000 = vmatprep.subr.bf16.mxu0 %v999_v8  ;;  %v1005_v19 = vpack.c.bf16 %v45_v16, %v44_v15  ;;  %v1007_v20 = vpack.c.bf16 %v63_v18, %v62_v17  ;;  %v47_v22 = vld [vmem:[%s1737_s1 + $0x38] sm:$0xff]  ;;  %v64_v23 = vld [vmem:[%s1737_s1 + $0xc0] sm:$0xff]  ;;  %v65_v24 = vld [vmem:[%s1737_s1 + $0xc8] sm:$0xff] }
   0x7   :  { %v1276_v25 = vld [vmem:[%s1738_s0 + $0x8] sm:$0xff]  ;;  %v1009_v26 = vpack.c.bf16 %v47_v22, %v46_v21  ;;  %v48_v27 = vld [vmem:[%s1737_s1 + $0x40] sm:$0xff]  ;;  %v66_v29 = vld [vmem:[%s1737_s1 + $0xd0] sm:$0xff]  ;;  %v1011_v30 = vpack.c.bf16 %v65_v24, %v64_v23 }
   0x8   :  { %143 = vmatprep.mubr.f32.mxu0 %v1276_v25  ;;  %v49_v28 = vld [vmem:[%s1737_s1 + $0x48] sm:$0xff]  ;;  %v67_v31 = vld [vmem:[%s1737_s1 + $0xd8] sm:$0xff]  ;;  %v202_v32 = vld [vmem:[%s1739_s3 + $0x80] sm:$0xff] }
   0x9   :  { %1002 = vmatpush3.bf16.msra.mxu0 %v1001_v13  ;;  %v203_v33 = vld [vmem:[%s1739_s3 + $0x88] sm:$0xff]  ;;  %v186_v35 = vld [vmem:[%s1739_s3] sm:$0xff]  ;;  %v204_v37 = vld [vmem:[%s1739_s3 + $0x90] sm:$0xff]  ;;  %v1013_v41 = vpack.c.bf16 %v49_v28, %v48_v27  ;;  %v1015_v46 = vpack.c.bf16 %v67_v31, %v66_v29 }
   0xa   :  { %1004 = vmatprep.subr.bf16.mxu0 %v1003_v14  ;;  %v1027_v34 = vpack.c.bf16 %v203_v33, %v202_v32  ;;  %v187_v36 = vld [vmem:[%s1739_s3 + $0x8] sm:$0xff]  ;;  %v50_v38 = vld [vmem:[%s1737_s1 + $0x50] sm:$0xff]  ;;  %v205_v40 = vld [vmem:[%s1739_s3 + $0x98] sm:$0xff] }
   0xb   :  { %v1029_v39 = vpack.c.bf16 %v187_v36, %v186_v35  ;;  %v1031_v42 = vpack.c.bf16 %v205_v40, %v204_v37  ;;  %v188_v43 = vld [vmem:[%s1739_s3 + $0x10] sm:$0xff]  ;;  %v189_v44 = vld [vmem:[%s1739_s3 + $0x18] sm:$0xff]  ;;  %v206_v45 = vld [vmem:[%s1739_s3 + $0xa0] sm:$0xff] }
   0xc   :  { %1028 = vmatprep.subr.bf16.mxu1 %v1027_v34  ;;  %v51_v47 = vld [vmem:[%s1737_s1 + $0x58] sm:$0xff]  ;;  %v68_v48 = vld [vmem:[%s1737_s1 + $0xe0] sm:$0xff]  ;;  %v1033_v49 = vpack.c.bf16 %v189_v44, %v188_v43  ;;  %v207_v50 = vld [vmem:[%s1739_s3 + $0xa8] sm:$0xff] }
   0xd   :  { %1006 = vmatpush3.bf16.msra.mxu0 %v1005_v19  ;;  %1030 = vmatpush3.bf16.msra.mxu1 %v1029_v39  ;;  %v69_v51 = vld [vmem:[%s1737_s1 + $0xe8] sm:$0xff]  ;;  %v1035_v52 = vpack.c.bf16 %v207_v50, %v206_v45  ;;  %v190_v53 = vld [vmem:[%s1739_s3 + $0x20] sm:$0xff]  ;;  %v208_v55 = vld [vmem:[%s1739_s3 + $0xb0] sm:$0xff]  ;;  %v1017_v57 = vpack.c.bf16 %v51_v47, %v50_v38 }
   0xe   :  { %1008 = vmatprep.subr.bf16.mxu0 %v1007_v20  ;;  %1032 = vmatprep.subr.bf16.mxu1 %v1031_v42  ;;  %v191_v54 = vld [vmem:[%s1739_s3 + $0x28] sm:$0xff]  ;;  %v209_v56 = vld [vmem:[%s1739_s3 + $0xb8] sm:$0xff]  ;;  %v1019_v58 = vpack.c.bf16 %v69_v51, %v68_v48  ;;  %v52_v59 = vld [vmem:[%s1737_s1 + $0x60] sm:$0xff]  ;;  %v1166_v20 = vmov 0.0|0.0  }
   0xf   :  { %v53_v60 = vld [vmem:[%s1737_s1 + $0x68] sm:$0xff]  ;;  %v70_v61 = vld [vmem:[%s1737_s1 + $0xf0] sm:$0xff]  ;;  %v1037_v62 = vpack.c.bf16 %v191_v54, %v190_v53  ;;  %v71_v63 = vld [vmem:[%s1737_s1 + $0xf8] sm:$0xff]  ;;  %v1039_v0 = vpack.c.bf16 %v209_v56, %v208_v55 }
  0x10   :  { %v192_v1 = vld [vmem:[%s1739_s3 + $0x30] sm:$0xff]  ;;  %v193_v2 = vld [vmem:[%s1739_s3 + $0x38] sm:$0xff]  ;;  %v210_v3 = vld [vmem:[%s1739_s3 + $0xc0] sm:$0xff]  ;;  %v1021_v5 = vpack.c.bf16 %v53_v60, %v52_v59  ;;  %v1023_v6 = vpack.c.bf16 %v71_v63, %v70_v61 }
  0x11   :  { %1010 = vmatpush3.bf16.msra.mxu0 %v1009_v26  ;;  %1034 = vmatpush3.bf16.msra.mxu1 %v1033_v49  ;;  %v211_v4 = vld [vmem:[%s1739_s3 + $0xc8] sm:$0xff]  ;;  %v54_v7 = vld [vmem:[%s1737_s1 + $0x70] sm:$0xff]  ;;  %v55_v8 = vld [vmem:[%s1737_s1 + $0x78] sm:$0xff]  ;;  %v1041_v9 = vpack.c.bf16 %v193_v2, %v192_v1  ;;  %v1168_v1 = vmov 0.0  }
  0x12   :  { %1012 = vmatprep.subr.bf16.mxu0 %v1011_v30  ;;  %1036 = vmatprep.subr.bf16.mxu1 %v1035_v52  ;;  %v1043_v10 = vpack.c.bf16 %v211_v4, %v210_v3  ;;  %v194_v11 = vld [vmem:[%s1739_s3 + $0x40] sm:$0xff]  ;;  %v195_v12 = vld [vmem:[%s1739_s3 + $0x48] sm:$0xff]  ;;  %v1025_v13 = vpack.c.bf16 %v55_v8, %v54_v7  ;;  %v34_v19 = vld [vmem:[%s1738_s0 + $0x10] sm:$0xff] }
  0x13   :  { %v218_v14 = vld [vmem:[%s1739_s3 + $0x100] sm:$0xff]  ;;  %v219_v15 = vld [vmem:[%s1739_s3 + $0x108] sm:$0xff]  ;;  %v1045_v16 = vpack.c.bf16 %v195_v12, %v194_v11  ;;  %v220_v21 = vld [vmem:[%s1739_s3 + $0x110] sm:$0xff] }
  0x14   :  { %v32_v17 = vld [vmem:[%s1738_s0] sm:$0xff]  ;;  %v1060_v18 = vpack.c.bf16 %v219_v15, %v218_v14  ;;  %v221_v22 = vld [vmem:[%s1739_s3 + $0x118] sm:$0xff]  ;;  %v223_v27 = vld [vmem:[%s1739_s3 + $0x128] sm:$0xff] }
  0x15   :  { %1014 = vmatpush3.bf16.msra.mxu0 %v1013_v41  ;;  %1038 = vmatpush3.bf16.msra.mxu1 %v1037_v62  ;;  %v1063_v23 = vpack.c.bf16 %v221_v22, %v220_v21  ;;  %v35_v24 = vld [vmem:[%s1738_s0 + $0x18] sm:$0xff]  ;;  %v222_v26 = vld [vmem:[%s1739_s3 + $0x120] sm:$0xff]  ;;  %v224_v30 = vld [vmem:[%s1739_s3 + $0x130] sm:$0xff] }
  0x16   :  { %1016 = vmatprep.subr.bf16.mxu0 %v1015_v46  ;;  %1040 = vmatprep.subr.bf16.mxu1 %v1039_v0  ;;  %v1066_v28 = vpack.c.bf16 %v223_v27, %v222_v26  ;;  %v36_v29 = vld [vmem:[%s1738_s0 + $0x20] sm:$0xff]  ;;  %v225_v31 = vld [vmem:[%s1739_s3 + $0x138] sm:$0xff]  ;;  %v37_v32 = vld [vmem:[%s1738_s0 + $0x28] sm:$0xff] }
  0x17   :  { %v38_v33 = vld [vmem:[%s1738_s0 + $0x30] sm:$0xff]  ;;  %v39_v34 = vld [vmem:[%s1738_s0 + $0x38] sm:$0xff]  ;;  %v226_v37 = vld [vmem:[%s1739_s3 + $0x140] sm:$0xff] }
  0x18   :  { %v212_v35 = vld [vmem:[%s1739_s3 + $0xd0] sm:$0xff]  ;;  %v213_v36 = vld [vmem:[%s1739_s3 + $0xd8] sm:$0xff]  ;;  %v227_v39 = vld [vmem:[%s1739_s3 + $0x148] sm:$0xff] }
  0x19   :  { %1018 = vmatpush3.bf16.msra.mxu0 %v1017_v57  ;;  %1042 = vmatpush3.bf16.msra.mxu1 %v1041_v9  ;;  %v1047_v38 = vpack.c.bf16 %v213_v36, %v212_v35  ;;  %v196_v40 = vld [vmem:[%s1739_s3 + $0x50] sm:$0xff]  ;;  %v197_v41 = vld [vmem:[%s1739_s3 + $0x58] sm:$0xff]  ;;  %v1072_v42 = vpack.c.bf16 %v227_v39, %v226_v37  ;;  %v214_v44 = vld [vmem:[%s1739_s3 + $0xe0] sm:$0xff] }
  0x1a   :  { %1020 = vmatprep.subr.bf16.mxu0 %v1019_v58  ;;  %1044 = vmatprep.subr.bf16.mxu1 %v1043_v10  ;;  %v1049_v43 = vpack.c.bf16 %v197_v41, %v196_v40  ;;  %v215_v45 = vld [vmem:[%s1739_s3 + $0xe8] sm:$0xff]  ;;  %v228_v46 = vld [vmem:[%s1739_s3 + $0x150] sm:$0xff]  ;;  %v229_v48 = vld [vmem:[%s1739_s3 + $0x158] sm:$0xff] }
  0x1b   :  { %v1051_v47 = vpack.c.bf16 %v215_v45, %v214_v44  ;;  %v198_v49 = vld [vmem:[%s1739_s3 + $0x60] sm:$0xff]  ;;  %v199_v50 = vld [vmem:[%s1739_s3 + $0x68] sm:$0xff]  ;;  %v1075_v51 = vpack.c.bf16 %v229_v48, %v228_v46  ;;  %v216_v53 = vld [vmem:[%s1739_s3 + $0xf0] sm:$0xff] }
  0x1c   :  { %v1053_v52 = vpack.c.bf16 %v199_v50, %v198_v49  ;;  %v217_v54 = vld [vmem:[%s1739_s3 + $0xf8] sm:$0xff]  ;;  %v230_v55 = vld [vmem:[%s1739_s3 + $0x160] sm:$0xff]  ;;  %v231_v57 = vld [vmem:[%s1739_s3 + $0x168] sm:$0xff] }
  0x1d   :  { %1022 = vmatpush3.bf16.msra.mxu0 %v1021_v5  ;;  %1046 = vmatpush3.bf16.msra.mxu1 %v1045_v16  ;;  %v1055_v56 = vpack.c.bf16 %v217_v54, %v216_v53  ;;  %v200_v58 = vld [vmem:[%s1739_s3 + $0x70] sm:$0xff]  ;;  %v201_v59 = vld [vmem:[%s1739_s3 + $0x78] sm:$0xff]  ;;  %v1078_v60 = vpack.c.bf16 %v231_v57, %v230_v55  ;;  %v420_v2 = vld [vmem:[%s1740_s5 + $0x80] sm:$0xff] }
  0x1e   :  { %1024 = vmatprep.subr.bf16.mxu0 %v1023_v6  ;;  %1048 = vmatprep.subr.bf16.mxu1 %v1047_v38  ;;  %v1057_v61 = vpack.c.bf16 %v201_v59, %v200_v58  ;;  %v232_v62 = vld [vmem:[%s1739_s3 + $0x170] sm:$0xff]  ;;  %v233_v63 = vld [vmem:[%s1739_s3 + $0x178] sm:$0xff]  ;;  %v421_v3 = vld [vmem:[%s1740_s5 + $0x88] sm:$0xff] }
  0x1f   :  { %v1081_v0 = vpack.c.bf16 %v233_v63, %v232_v62  ;;  %v1083_v4 = vpack.c.bf16 %v421_v3, %v420_v2  ;;  %v1507_v8 = vld [vmem:[%s1741_s2] ss:$0 sm:$0xff]  ;;  %v405_v14 = vld [vmem:[%s1740_s5 + $0x8] sm:$0xff]  ;;  %v438_v39 = vld [vmem:[%s1740_s5 + $0x110] sm:$0xff] }
  0x20   :  { %v437_v26 = vld [vmem:[%s1740_s5 + $0x108] sm:$0xff]  ;;  %v439_v40 = vld [vmem:[%s1740_s5 + $0x118] sm:$0xff]  ;;  %v426_v46 = vld [vmem:[%s1740_s5 + $0xb0] sm:$0xff] }
  0x21   :  { %1026 = vmatpush3.bf16.msra.mxu0 %v1025_v13  ;;  %1050 = vmatpush3.bf16.msra.mxu1 %v1049_v43  ;;  %v404_v13 = vld [vmem:[%s1740_s5] sm:$0xff]  ;;  %v409_v43 = vld [vmem:[%s1740_s5 + $0x28] sm:$0xff]  ;;  %v1119_v49 = vpack.c.bf16 %v439_v40, %v438_v39  ;;  %v410_v3 = vld [vmem:[%s1740_s5 + $0x30] sm:$0xff] }
  0x22   :  { %1059 = vmatprep.subr.bf16.mxu0 %v1166_v20  ;;  %1052 = vmatprep.subr.bf16.mxu1 %v1051_v47  ;;  %v427_v47 = vld [vmem:[%s1740_s5 + $0xb8] sm:$0xff]  ;;  %v418_v39 = vld [vmem:[%s1740_s5 + $0x70] sm:$0xff] }
  0x23   :  { %v1095_v53 = vpack.c.bf16 %v427_v47, %v426_v46  ;;  %v419_v40 = vld [vmem:[%s1740_s5 + $0x78] sm:$0xff]  ;;  %v450_v46 = vld [vmem:[%s1740_s5 + $0x170] sm:$0xff] }
  0x24   :  { %144 = vmatmul.mubr.f32.vlgmr.msra.gmra.mrb[0].mxu0 %v32_v17  ;;  %v422_v17 = vld [vmem:[%s1740_s5 + $0x90] sm:$0xff]  ;;  %v451_v47 = vld [vmem:[%s1740_s5 + $0x178] sm:$0xff] }
  0x25   :  { %148 = vmatprep.mubr.f32.mxu0 %v34_v19  ;;  %1061 = vmatpush3.bf16.msra.mxu0 %v1060_v18  ;;  %v423_v18 = vld [vmem:[%s1740_s5 + $0x98] sm:$0xff] }
  0x26   :  { %1062 = vmatprep.subr.bf16.mxu0 %v1166_v20  ;;  %1054 = vmatpush3.bf16.msra.mxu1 %v1053_v52 }
  0x27   :  { %1056 = vmatprep.subr.bf16.mxu1 %v1055_v56 }
  0x28   :  { %149 = vmatmul.mubr.f32.gmra.mrb[2].mxu0 %v1276_v25  ;;  %v1069_v25 = vpack.c.bf16 %v225_v31, %v224_v30  ;;  %v407_v30 = vld [vmem:[%s1740_s5 + $0x18] sm:$0xff] }
  0x29   :  { %153 = vmatprep.mubr.f32.mxu0 %v35_v24  ;;  %1064 = vmatpush3.bf16.msra.mxu0 %v1063_v23  ;;  %v1085_v23 = vpack.c.bf16 %v405_v14, %v404_v13 }
  0x2a   :  { %1065 = vmatprep.subr.bf16.mxu0 %v1166_v20  ;;  %1058 = vmatpush3.bf16.msra.mxu1 %v1057_v61 }
  0x2b   :  { %1084 = vmatprep.subr.bf16.mxu1 %v1083_v4  ;;  %v411_v4 = vld [vmem:[%s1740_s5 + $0x38] sm:$0xff] }
  0x2c   :  { %154 = vmatmul.mubr.f32.gmra.mrb[4].mxu0 %v34_v19 }
  0x2d   :  { %158 = vmatprep.mubr.f32.mxu0 %v36_v29  ;;  %1067 = vmatpush3.bf16.msra.mxu0 %v1066_v28  ;;  %v1087_v28 = vpack.c.bf16 %v423_v18, %v422_v17  ;;  %v442_v17 = vld [vmem:[%s1740_s5 + $0x130] sm:$0xff] }
  0x2e   :  { %1068 = vmatprep.subr.bf16.mxu0 %v1166_v20 }
  0x30   :  { %159 = vmatmul.mubr.f32.gmra.mrb[6].mxu0 %v35_v24  ;;  %v436_v24 = vld [vmem:[%s1740_s5 + $0x100] sm:$0xff] }
  0x31   :  { %163 = vmatprep.mubr.f32.mxu0 %v37_v32  ;;  %1070 = vmatpush3.bf16.msra.mxu0 %v1069_v25  ;;  %v1116_v35 = vpack.c.bf16 %v437_v26, %v436_v24  ;;  %v432_v26 = vld [vmem:[%s1740_s5 + $0xe0] sm:$0xff] }
  0x32   :  { %1071 = vmatprep.subr.bf16.mxu0 %v1166_v20 }
  0x34   :  { %164 = vmatmul.mubr.f32.gmra.mrb[8].mxu0 %v36_v29  ;;  %v406_v29 = vld [vmem:[%s1740_s5 + $0x10] sm:$0xff] }
  0x35   :  { %168 = vmatprep.mubr.f32.mxu0 %v38_v33  ;;  %1073 = vmatpush3.bf16.msra.mxu0 %v1072_v42  ;;  %v1089_v38 = vpack.c.bf16 %v407_v30, %v406_v29  ;;  %v408_v42 = vld [vmem:[%s1740_s5 + $0x20] sm:$0xff]  ;;  %v445_v30 = vld [vmem:[%s1740_s5 + $0x148] sm:$0xff] }
  0x36   :  { %1074 = vmatprep.subr.bf16.mxu0 %v1166_v20  ;;  %v1093_v52 = vpack.c.bf16 %v409_v43, %v408_v42  ;;  %v1113_v42 = vpack.c.bf16 %v419_v40, %v418_v39  ;;  %v448_v43 = vld [vmem:[%s1740_s5 + $0x160] sm:$0xff] }
  0x38   :  { %169 = vmatmul.mubr.f32.gmra.mrb[10].mxu0 %v37_v32  ;;  %v424_v32 = vld [vmem:[%s1740_s5 + $0xa0] sm:$0xff] }
  0x39   :  { %173 = vmatprep.mubr.f32.mxu0 %v39_v34  ;;  %1076 = vmatpush3.bf16.msra.mxu0 %v1075_v51 }
  0x3a   :  { %1077 = vmatprep.subr.bf16.mxu0 %v1166_v20 }
  0x3c   :  { %174 = vmatmul.mubr.f32.gmra.mrb[12].mxu0 %v38_v33  ;;  %v425_v33 = vld [vmem:[%s1740_s5 + $0xa8] sm:$0xff] }
  0x3d   :  { %1079 = vmatpush3.bf16.msra.mxu0 %v1078_v60  ;;  %916 = vmatprep.mubr.msk.f32.mxu0 %vm1167_vm0, %v1168_v1  ;;  %v1091_v41 = vpack.c.bf16 %v425_v33, %v424_v32 }
  0x3e   :  { %1080 = vmatprep.subr.bf16.mxu0 %v1166_v20 }
  0x41   :  { %1082 = vmatpush3.bf16.msra.mxu0 %v1081_v0 }
  0x42   :  { %1115 = vmatprep.subr.bf16.mxu0 %v1166_v20 }
  0xf7   :  { %v734_v5 = vpop.f32.mrb[0].mxu0 }
  0xf8   :  { %v735_v6 = vpop.f32.mrb[1].mxu0 }
  0xf9   :  { %v736_v7 = vadd.f32 %v735_v6, %v734_v5  ;;  %v1097_v5 = vpack.c.bf16 %v411_v4, %v410_v3  ;;  %v428_v6 = vld [vmem:[%s1740_s5 + $0xc0] sm:$0xff] }
  0xfb   :  { %v737_v9 = vpop.f32.mrb[2].mxu0  ;;  %v146_v12 = vadd.f32 %v736_v7, %v1507_v8  ;;  %v429_v7 = vld [vmem:[%s1740_s5 + $0xc8] sm:$0xff] }
  0xfc   :  { %v738_v10 = vpop.f32.mrb[3].mxu0 }
  0xfd   :  { %v739_v11 = vadd.f32 %v738_v10, %v737_v9  ;;  %v179_v27 = vmax.f32 %v146_v12, 0.0  ;;  %v1099_v9 = vpack.c.bf16 %v429_v7, %v428_v6  ;;  %v441_v10 = vld [vmem:[%s1740_s5 + $0x128] sm:$0xff] }
  0xfe   :  { %v413_v12 = vld [vmem:[%s1740_s5 + $0x48] sm:$0xff] }
  0xff   :  { %v740_v15 = vpop.f32.mrb[4].mxu0  ;;  %v151_v16 = vadd.f32 %v739_v11, %v1507_v8  ;;  %v412_v11 = vld [vmem:[%s1740_s5 + $0x40] sm:$0xff] }
 0x100   :  { %v741_v19 = vpop.f32.mrb[5].mxu0  ;;  %v1101_v14 = vpack.c.bf16 %v413_v12, %v412_v11 }
 0x101   :  { %v742_v21 = vadd.f32 %v741_v19, %v740_v15  ;;  %v180_v22 = vmax.f32 %v151_v16, 0.0  ;;  %v430_v15 = vld [vmem:[%s1740_s5 + $0xd0] sm:$0xff]  ;;  %v431_v16 = vld [vmem:[%s1740_s5 + $0xd8] sm:$0xff] }
 0x102   :  { %v1103_v18 = vpack.c.bf16 %v431_v16, %v430_v15  ;;  %v443_v19 = vld [vmem:[%s1740_s5 + $0x138] sm:$0xff]  ;;  %v604_v15 = vld [vmem:[%s1743_s7 + $0x20] sm:$0xff]  ;;  %v605_v16 = vld [vmem:[%s1743_s7 + $0x28] sm:$0xff] }
 0x103   :  { %v156_v31 = vadd.f32 %v742_v21, %v1507_v8  ;;  %v743_v25 = vpop.f32.mrb[6].mxu0  ;;  %305 = vmatprep.mubr.f32.mxu1 %v180_v22  ;;  %v414_v21 = vld [vmem:[%s1740_s5 + $0x50] sm:$0xff]  ;;  %v415_v22 = vld [vmem:[%s1740_s5 + $0x58] sm:$0xff] }
 0x104   :  { %v744_v34 = vpop.f32.mrb[7].mxu0  ;;  %306 = vmatmul.mubr.f32.vlgmr.msra.gmra.mrb[0].mxu1 %v179_v27  ;;  %v1105_v24 = vpack.c.bf16 %v415_v22, %v414_v21  ;;  %v433_v27 = vld [vmem:[%s1740_s5 + $0xe8] sm:$0xff]  ;;  %v607_v21 = vld [vmem:[%s1743_s7 + $0x38] sm:$0xff] }
 0x105   :  { %v181_v36 = vmax.f32 %v156_v31, 0.0  ;;  %v745_v37 = vadd.f32 %v744_v34, %v743_v25  ;;  %1086 = vmatpush3.bf16.msra.mxu1 %v1085_v23  ;;  %v1125_v23 = vpack.c.bf16 %v443_v19, %v442_v17  ;;  %v1107_v29 = vpack.c.bf16 %v433_v27, %v432_v26  ;;  %v416_v31 = vld [vmem:[%s1740_s5 + $0x60] sm:$0xff]  ;;  %v417_v25 = vld [vmem:[%s1740_s5 + $0x68] sm:$0xff]  ;;  %v434_v34 = vld [vmem:[%s1740_s5 + $0xf0] sm:$0xff] }
 0x106   :  { %1088 = vmatprep.subr.bf16.mxu1 %v1087_v28  ;;  %v444_v28 = vld [vmem:[%s1740_s5 + $0x140] sm:$0xff]  ;;  %v1109_v33 = vpack.c.bf16 %v417_v25, %v416_v31  ;;  %v1146_v19 = vpack.c.bf16 %v605_v16, %v604_v15  ;;  %v610_v27 = vld [vmem:[%s1743_s7 + $0x50] sm:$0xff]  ;;  %v613_v31 = vld [vmem:[%s1743_s7 + $0x68] sm:$0xff] }
 0x107   :  { %v161_v44 = vadd.f32 %v745_v37, %v1507_v8  ;;  %v746_v45 = vpop.f32.mrb[8].mxu0  ;;  %917 = vmatmul.mubr.f32.vlgmr.msra.gmra.mrb[14].mxu0 %v181_v36  ;;  %v1128_v32 = vpack.c.bf16 %v445_v30, %v444_v28  ;;  %v611_v28 = vld [vmem:[%s1743_s7 + $0x58] sm:$0xff]  ;;  %v612_v30 = vld [vmem:[%s1743_s7 + $0x60] sm:$0xff] }
 0x108   :  { %v747_v48 = vpop.f32.mrb[9].mxu0  ;;  %919 = vmatprep.mubr.msk.f32.mxu0 %vm1167_vm0, %v1168_v1  ;;  %1117 = vmatpush3.bf16.msra.mxu0 %v1116_v35  ;;  %v435_v35 = vld [vmem:[%s1740_s5 + $0xf8] sm:$0xff]  ;;  %v1158_v25 = vpack.c.bf16 %v613_v31, %v612_v30 }
 0x109   :  { %v182_v50 = vmax.f32 %v161_v44, 0.0  ;;  %v748_v51 = vadd.f32 %v747_v48, %v746_v45  ;;  %1090 = vmatpush3.bf16.msra.mxu1 %v1089_v38  ;;  %1118 = vmatprep.subr.bf16.mxu0 %v1166_v20  ;;  %v1111_v37 = vpack.c.bf16 %v435_v35, %v434_v34  ;;  %v447_v38 = vld [vmem:[%s1740_s5 + $0x158] sm:$0xff]  ;;  %v449_v44 = vld [vmem:[%s1740_s5 + $0x168] sm:$0xff]  ;;  %v1137_v48 = vpack.c.bf16 %v451_v47, %v450_v46 }
 0x10a   :  { %1092 = vmatprep.subr.bf16.mxu1 %v1091_v41  ;;  %v1134_v45 = vpack.c.bf16 %v449_v44, %v448_v43  ;;  %v701_v43 = vld [vmem:[%s1745_s8] ss:$0 sm:$0xff] }
 0x10b   :  { %v166_v54 = vadd.f32 %v748_v51, %v1507_v8  ;;  %v749_v55 = vpop.f32.mrb[10].mxu0  ;;  %310 = vmatprep.mubr.f32.mxu1 %v182_v50  ;;  %v699_v51 = vld [vmem:[%s1742_s4] ss:$0 sm:$0xff] }
 0x10c   :  { %v750_v56 = vpop.f32.mrb[11].mxu0  ;;  %311 = vmatmul.mubr.f32.gmra.mrb[2].mxu1 %v181_v36  ;;  %1120 = vmatpush3.bf16.msra.mxu0 %v1119_v49  ;;  %v446_v36 = vld [vmem:[%s1740_s5 + $0x150] sm:$0xff] }
 0x10d   :  { %v183_v57 = vmax.f32 %v166_v54, 0.0  ;;  %v751_v58 = vadd.f32 %v750_v56, %v749_v55  ;;  %1094 = vmatpush3.bf16.msra.mxu1 %v1093_v52  ;;  %1121 = vmatprep.subr.bf16.mxu0 %v1166_v20  ;;  %v1131_v41 = vpack.c.bf16 %v447_v38, %v446_v36  ;;  %v700_v38 = vld [vmem:[%s1744_s6] ss:$0 sm:$0xff] }
 0x10e   :  { %1096 = vmatprep.subr.bf16.mxu1 %v1095_v53 }
 0x10f   :  { %v171_v59 = vadd.f32 %v751_v58, %v1507_v8  ;;  %v752_v60 = vpop.f32.mrb[12].mxu0  ;;  %920 = vmatmul.mubr.f32.gmra.mrb[16].mxu0 %v183_v57 }
 0x110   :  { %v753_v61 = vpop.f32.mrb[13].mxu0  ;;  %922 = vmatprep.mubr.msk.f32.mxu0 %vm1167_vm0, %v1168_v1 }
 0x111   :  { %v184_v62 = vmax.f32 %v171_v59, 0.0  ;;  %v754_v63 = vadd.f32 %v753_v61, %v752_v60  ;;  %1098 = vmatpush3.bf16.msra.mxu1 %v1097_v5 }
 0x112   :  { %1100 = vmatprep.subr.bf16.mxu1 %v1099_v9  ;;  %v603_v9 = vld [vmem:[%s1743_s7 + $0x18] sm:$0xff] }
 0x113   :  { %v176_v0 = vadd.f32 %v754_v63, %v1507_v8  ;;  %315 = vmatprep.mubr.f32.mxu1 %v184_v62  ;;  %v440_v8 = vld [vmem:[%s1740_s5 + $0x120] sm:$0xff] }
 0x114   :  { %316 = vmatmul.mubr.f32.gmra.mrb[4].mxu1 %v183_v57  ;;  %v1122_v13 = vpack.c.bf16 %v441_v10, %v440_v8  ;;  %v600_v63 = vld [vmem:[%s1743_s7] sm:$0xff]  ;;  %v602_v8 = vld [vmem:[%s1743_s7 + $0x10] sm:$0xff] }
 0x115   :  { %v185_v2 = vmax.f32 %v176_v0, 0.0  ;;  %1102 = vmatpush3.bf16.msra.mxu1 %v1101_v14  ;;  %v601_v0 = vld [vmem:[%s1743_s7 + $0x8] sm:$0xff]  ;;  %v1143_v14 = vpack.c.bf16 %v603_v9, %v602_v8 }
 0x116   :  { %1123 = vmatpush3.bf16.msra.mxu0 %v1122_v13  ;;  %1104 = vmatprep.subr.bf16.mxu1 %v1103_v18  ;;  %v1140_v5 = vpack.c.bf16 %v601_v0, %v600_v63 }
 0x117   :  { %923 = vmatmul.mubr.f32.gmra.mrb[18].mxu0 %v185_v2  ;;  %1124 = vmatprep.subr.bf16.mxu0 %v1166_v20 }
 0x118   :  { %957 = vmatprep.mubr.msk.f32.mxu0 %vm1167_vm0, %v1168_v1 }
 0x119   :  { %1106 = vmatpush3.bf16.msra.mxu1 %v1105_v24  ;;  %v609_v24 = vld [vmem:[%s1743_s7 + $0x48] sm:$0xff] }
 0x11a   :  { %1126 = vmatpush3.bf16.msra.mxu0 %v1125_v23  ;;  %1108 = vmatprep.subr.bf16.mxu1 %v1107_v29  ;;  %v608_v23 = vld [vmem:[%s1743_s7 + $0x40] sm:$0xff]  ;;  %v1155_v29 = vpack.c.bf16 %v611_v28, %v610_v27 }
 0x11b   :  { %1127 = vmatprep.subr.bf16.mxu0 %v1166_v20  ;;  %v1152_v26 = vpack.c.bf16 %v609_v24, %v608_v23 }
 0x11d   :  { %1110 = vmatpush3.bf16.msra.mxu1 %v1109_v33  ;;  %v615_v33 = vld [vmem:[%s1743_s7 + $0x78] sm:$0xff] }
 0x11e   :  { %1129 = vmatpush3.bf16.msra.mxu0 %v1128_v32  ;;  %1112 = vmatprep.subr.bf16.mxu1 %v1111_v37  ;;  %v614_v32 = vld [vmem:[%s1743_s7 + $0x70] sm:$0xff] }
 0x11f   :  { %1130 = vmatprep.subr.bf16.mxu0 %v1166_v20  ;;  %v1161_v34 = vpack.c.bf16 %v615_v33, %v614_v32 }
 0x121   :  { %1114 = vmatpush3.bf16.msra.mxu1 %v1113_v42 }
 0x122   :  { %1132 = vmatpush3.bf16.msra.mxu0 %v1131_v41  ;;  %1139 = vmatprep.subr.bf16.mxu1 %v1166_v20 }
 0x123   :  { %1133 = vmatprep.subr.bf16.mxu0 %v1166_v20 }
 0x126   :  { %1135 = vmatpush3.bf16.msra.mxu0 %v1134_v45 }
 0x127   :  { %1136 = vmatprep.subr.bf16.mxu0 %v1166_v20 }
 0x12a   :  { %1138 = vmatpush3.bf16.msra.mxu0 %v1137_v48 }
 0x1d7   :  { %v787_v49 = vpop.f32.mrb[0].mxu1 }
 0x1d8   :  { %v788_v50 = vpop.f32.mrb[1].mxu1 }
 0x1d9   :  { %v789_v52 = vadd.f32 %v788_v50, %v787_v49 }
 0x1da   :  { %v387_v53 = vpop.f32.mrb[14].mxu0 }
 0x1db   :  { %v308_v54 = vadd.f32 %v789_v52, %v699_v51  ;;  %v918_v55 = vpop.f32.mrb[15].mxu0 }
 0x1dd   :  { %v388_v56 = vadd.f32 %v387_v53, %v308_v54 }
 0x1df   :  { %v790_v57 = vpop.f32.mrb[2].mxu1  ;;  %v401_v6 = vmax.f32 %v388_v56, 0.0 }
 0x1e0   :  { %v791_v58 = vpop.f32.mrb[3].mxu1 }
 0x1e1   :  { %v792_v59 = vadd.f32 %v791_v58, %v790_v57 }
 0x1e2   :  { %v392_v60 = vpop.f32.mrb[16].mxu0 }
 0x1e3   :  { %v313_v61 = vadd.f32 %v792_v59, %v699_v51  ;;  %v921_v62 = vpop.f32.mrb[17].mxu0 }
 0x1e5   :  { %v393_v2 = vadd.f32 %v392_v60, %v313_v61 }
 0x1e7   :  { %v402_v3 = vmax.f32 %v393_v2, 0.0  ;;  %v793_v4 = vpop.f32.mrb[4].mxu1 }
 0x1e8   :  { %v794_v7 = vpop.f32.mrb[5].mxu1 }
 0x1e9   :  { %v795_v10 = vadd.f32 %v794_v7, %v793_v4  ;;  %523 = vmatprep.mubr.f32.mxu1 %v402_v3 }
 0x1ea   :  { %v397_v11 = vpop.f32.mrb[18].mxu0  ;;  %524 = vmatmul.mubr.f32.vlgmr.msra.gmra.mrb[6].mxu1 %v401_v6 }
 0x1eb   :  { %v318_v12 = vadd.f32 %v795_v10, %v699_v51  ;;  %v924_v13 = vpop.f32.mrb[19].mxu0  ;;  %1141 = vmatpush3.bf16.msra.mxu1 %v1140_v5  ;;  %992 = vmatprep.mubr.msk.f32.mxu1 %vm1167_vm0, %v1168_v1  ;;  %v606_v1 = vld [vmem:[%s1743_s7 + $0x30] sm:$0xff] }
 0x1ec   :  { %1142 = vmatprep.subr.bf16.mxu1 %v1166_v20  ;;  %v1149_v22 = vpack.c.bf16 %v607_v21, %v606_v1 }
 0x1ed   :  { %v398_v17 = vadd.f32 %v397_v11, %v318_v12 }
 0x1ef   :  { %v403_v18 = vmax.f32 %v398_v17, 0.0  ;;  %1144 = vmatpush3.bf16.msra.mxu1 %v1143_v14 }
 0x1f0   :  { %1145 = vmatprep.subr.bf16.mxu1 %v1166_v20 }
 0x1f1   :  { %958 = vmatmul.mubr.f32.vlgmr.msra.gmra.mrb[20].mxu0 %v403_v18 }
 0x1f3   :  { %1147 = vmatpush3.bf16.msra.mxu1 %v1146_v19 }
 0x1f4   :  { %1148 = vmatprep.subr.bf16.mxu1 %v1166_v20 }
 0x1f7   :  { %1150 = vmatpush3.bf16.msra.mxu1 %v1149_v22 }
 0x1f8   :  { %1151 = vmatprep.subr.bf16.mxu1 %v1166_v20 }
 0x1fb   :  { %1153 = vmatpush3.bf16.msra.mxu1 %v1152_v26 }
 0x1fc   :  { %1154 = vmatprep.subr.bf16.mxu1 %v1166_v20 }
 0x1ff   :  { %1156 = vmatpush3.bf16.msra.mxu1 %v1155_v29 }
 0x200   :  { %1157 = vmatprep.subr.bf16.mxu1 %v1166_v20 }
 0x203   :  { %1159 = vmatpush3.bf16.msra.mxu1 %v1158_v25 }
 0x204   :  { %1160 = vmatprep.subr.bf16.mxu1 %v1166_v20 }
 0x207   :  { %1162 = vmatpush3.bf16.msra.mxu1 %v1161_v34 }
 0x2bd   :  { %v847_v35 = vpop.f32.mrb[6].mxu1 }
 0x2be   :  { %v848_v36 = vpop.f32.mrb[7].mxu1 }
 0x2bf   :  { %v849_v37 = vadd.f32 %v848_v36, %v847_v35 }
 0x2c1   :  { %v526_v39 = vadd.f32 %v849_v37, %v700_v38 }
 0x2c4   :  { %v595_v40 = vpop.f32.mrb[20].mxu0 }
 0x2c5   :  { %v596_v20 = vadd.f32 %v595_v40, %v526_v39  ;;  %v959_v41 = vpop.f32.mrb[21].mxu0 }
 0x2c7   :  { %v599_v42 = vmax.f32 %v596_v20, 0.0 }
 0x2c9   :  { %993 = vmatmul.mubr.f32.vlgmr.msra.gmra.mrb[8].mxu1 %v599_v42 }
 0x39c   :  { %v689_v44 = vpop.f32.mrb[8].mxu1 }
 0x39d   :  { %v690_v45 = vadd.f32 %v701_v43, %v689_v44  ;;  %v994_v46 = vpop.f32.mrb[9].mxu1 }
 0x39f   :  { %693 = vst [vmem:[%s1746_s9] sm:$0xff] %v690_v45 }

</bundles_post_ra>
